<compile_context>
chip_gen: v6e
topology: v6e:2x2x1
jax: 0.10.0
libtpu: 0.0.40
codegen_flags: <defaults>
</compile_context>

<pallas_src>
import functools

import jax
import jax.numpy as jnp
from jax.experimental import pallas as pl
from jax.experimental.pallas import tpu as pltpu


def _conv_bn_kernel_mxu(x_ref, w_ref, shift_ref, o_ref):
    # x_ref:     (1, Cin, ts)   one image's channel-major spatial tile (native dtype)
    # w_ref:     (Cout, Cin)    1x1 conv weight with BN scale folded in (compute dtype)
    # shift_ref: (Cout, 1)      folded BN shift incl. conv bias (f32)
    # o_ref:     (1, Cout, ts)  out dtype
    x = x_ref[0].astype(w_ref.dtype)                       # per-tile cast, no extra HBM pass
    y = jnp.dot(w_ref[...], x, preferred_element_type=jnp.float32)
    o_ref[0] = (y + shift_ref[...]).astype(o_ref.dtype)


def _conv_bn_kernel_vpu(x_ref, w_ref, shift_ref, o_ref, *, cin):
    # Tiny-Cin path: a K<=8 contraction wastes the MXU; do an unrolled
    # broadcast-FMA on the VPU with spatial in lanes.
    x = x_ref[0].astype(jnp.float32)                       # (Cin, ts)
    w = w_ref[...].astype(jnp.float32)                     # (Cout, Cin)
    cout, ts = w.shape[0], x.shape[1]
    acc = jnp.broadcast_to(shift_ref[...].astype(jnp.float32), (cout, ts))
    for c in range(cin):                                   # static unroll, cin <= 8
        acc = acc + w[:, c:c + 1] * x[c:c + 1, :]
    o_ref[0] = acc.astype(o_ref.dtype)


def single_conv_block(x, weight, bias, gamma, beta, running_mean, running_var,
                      *, stride, use_bn=True, eps=1e-5,
                      compute_dtype=jnp.float32, out_dtype=None,
                      max_spatial_tile=32768):
    """x: (N, Cin, H, W) NCHW. weight: (Cout, Cin, 1, 1). Returns NCHW out_dtype.

    compute_dtype controls the MXU operand dtype (bfloat16 recommended on v5e for
    the >=256-channel layers); accumulation is always f32. out_dtype defaults to
    compute_dtype so the store stream shrinks with it (this op is HBM-bound).
    """
    if out_dtype is None:
        out_dtype = compute_dtype
    N, Cin, H, W = x.shape
    Cout = weight.shape[0]

    # strided 1x1 conv == spatial subsample followed by per-pixel channel matmul
    xs = x if stride == 1 else x[:, :, ::stride, ::stride]
    Ho, Wo = xs.shape[2], xs.shape[3]
    S = Ho * Wo
    xs = xs.reshape(N, Cin, S)                              # free reshape, native dtype

    # Fold BN (eval) into weight + a single per-channel shift, all in f32.
    w2d = weight.reshape(Cout, Cin).astype(jnp.float32)
    if use_bn:
        scale = gamma.astype(jnp.float32) / jnp.sqrt(
            running_var.astype(jnp.float32) + eps)
        shift = ((bias.astype(jnp.float32) - running_mean.astype(jnp.float32))
                 * scale + beta.astype(jnp.float32))
        w2d = w2d * scale[:, None]
    else:
        shift = bias.astype(jnp.float32)
    w2d = w2d.astype(compute_dtype)
    shift = shift.reshape(Cout, 1)                          # stays f32

    in_bpe = jnp.dtype(xs.dtype).itemsize
    w_bpe = jnp.dtype(compute_dtype).itemsize
    out_bpe = jnp.dtype(out_dtype).itemsize

    # Generation-aware VMEM sizing (v5e/v6e: 128 MiB, v7x: 64 MiB per core).
    try:
        vmem_cap = int(getattr(pltpu.get_tpu_info(), "vmem_capacity_bytes", 64 << 20))
    except Exception:
        vmem_cap = 64 << 20
    vmem_limit = max(32 << 20, min((vmem_cap * 3) // 4, 96 << 20))

    # Bytes per spatial lane-column: double-buffered x/out blocks + f32 intermediates
    # (cast tile + accumulator); weight/shift double-buffer subtracted from budget.
    per_col = (2 * Cin * in_bpe + 2 * Cout * out_bpe
               + 4 * (Cin + Cout) + Cin * w_bpe)
    budget = max(1 << 20,
                 (vmem_limit * 7) // 10 - 2 * (Cout * Cin * w_bpe + Cout * 4))
    ts_cap = max(128, min(max_spatial_tile, (budget // per_col) // 128 * 128))
    ts = S if S <= ts_cap else ts_cap                       # ts % 128 == 0 or ts == S

    # v7x has 2 TensorCores: make sure the grid has >= 2 steps when possible.
    if N * pl.cdiv(S, ts) < 2 and S > 128:
        ts = max(128, (((S + 1) // 2 + 127) // 128) * 128)

    grid = (N, pl.cdiv(S, ts))                              # no pad copy; Pallas masks

    kernel = (functools.partial(_conv_bn_kernel_vpu, cin=Cin)
              if Cin <= 8 else _conv_bn_kernel_mxu)

    out = pl.pallas_call(
        kernel,
        out_shape=jax.ShapeDtypeStruct((N, Cout, S), out_dtype),
        grid_spec=pltpu.PrefetchScalarGridSpec(
            num_scalar_prefetch=0,
            grid=grid,
            in_specs=[
                pl.BlockSpec((1, Cin, ts), lambda n, j: (n, 0, j)),
                pl.BlockSpec((Cout, Cin), lambda n, j: (0, 0)),
                pl.BlockSpec((Cout, 1), lambda n, j: (0, 0)),
            ],
            out_specs=pl.BlockSpec((1, Cout, ts), lambda n, j: (n, 0, j)),
        ),
        compiler_params=pltpu.CompilerParams(
            dimension_semantics=("parallel", "parallel"),
            vmem_limit_bytes=vmem_limit),
        cost_estimate=pl.CostEstimate(
            flops=2 * N * S * Cin * Cout,
            transcendentals=0,
            bytes_accessed=N * S * (Cin * in_bpe + Cout * out_bpe)
                           + Cout * Cin * w_bpe + Cout * 4),
    )(xs, w2d, shift)

    # (N, Cout, S) -> (N, Cout, Ho, Wo): pure reshape, no data movement.
    return out.reshape(N, Cout, Ho, Wo)


def _reference(x, weight, bias, gamma, beta, running_mean, running_var,
               *, stride, use_bn=True, eps=1e-5):
    # pure-JAX reference (1x1 strided conv + eval-mode BN), NCHW
    xs = x[:, :, ::stride, ::stride]
    y = jnp.einsum('nchw,oc->nohw', xs, weight.reshape(weight.shape[0], -1))
    y = y + bias[None, :, None, None]
    if use_bn:
        y = (y - running_mean[None, :, None, None]) / jnp.sqrt(
            running_var[None, :, None, None] + eps)
        y = y * gamma[None, :, None, None] + beta[None, :, None, None]
    return y


if __name__ == "__main__":
    key = jax.random.PRNGKey(0)
    k_x, k_w, k_b, k_g, k_be, k_m, k_v = jax.random.split(key, 7)

    N, Cin, H, W = 2, 4, 16, 16
    Cout, stride = 8, 2

    x = jax.random.normal(k_x, (N, Cin, H, W), dtype=jnp.float32)
    weight = jax.random.normal(k_w, (Cout, Cin, 1, 1), dtype=jnp.float32) * 0.1
    bias = jax.random.normal(k_b, (Cout,), dtype=jnp.float32) * 0.1
    gamma = 1.0 + 0.1 * jax.random.normal(k_g, (Cout,), dtype=jnp.float32)
    beta = 0.1 * jax.random.normal(k_be, (Cout,), dtype=jnp.float32)
    running_mean = 0.1 * jax.random.normal(k_m, (Cout,), dtype=jnp.float32)
    running_var = jnp.abs(1.0 + 0.1 * jax.random.normal(k_v, (Cout,), dtype=jnp.float32))

    out = single_conv_block(x, weight, bias, gamma, beta,
                            running_mean, running_var,
                            stride=stride, use_bn=True)
    out = jax.block_until_ready(out)

    ref = _reference(x, weight, bias, gamma, beta,
                     running_mean, running_var,
                     stride=stride, use_bn=True)

    assert out.shape == (N, Cout, H // stride, W // stride), out.shape
    assert jnp.allclose(out, ref, atol=1e-4, rtol=1e-4), float(
        jnp.max(jnp.abs(out - ref)))
    print("KERNEL_OK")
</pallas_src>

<mosaic_0001>
module attributes {stable_mosaic.version = 11 : i64} {
  func.func @_conv_bn_kernel_vpu(%arg0: i32, %arg1: i32, %arg2: memref<1x4x64xf32, #tpu.memory_space<vmem>>, %arg3: memref<8x4xf32, #tpu.memory_space<vmem>>, %arg4: memref<8x1xf32, #tpu.memory_space<vmem>>, %arg5: memref<1x8x64xf32, #tpu.memory_space<vmem>>) attributes {dimension_semantics = [#tpu.dimension_semantics<parallel>, #tpu.dimension_semantics<parallel>], iteration_bounds = array<i64: 2, 1>, scalar_prefetch = 0 : i64, scratch_operands = 0 : i64, tpu.core_type = #tpu.core_type<tc>, window_params = [{transform_indices = @transform_0, window_bounds = array<i64: 1, 4, 64>}, {pipeline_mode = #tpu.pipeline_mode<synchronous>, transform_indices = @transform_1, window_bounds = array<i64: 8, 4>}, {pipeline_mode = #tpu.pipeline_mode<synchronous>, transform_indices = @transform_2, window_bounds = array<i64: 8, 1>}, {transform_indices = @transform_3, window_bounds = array<i64: 1, 8, 64>}]} {
    %c0 = arith.constant 0 : index
    %c0_0 = arith.constant 0 : index
    %c0_1 = arith.constant 0 : index
    %0 = vector.load %arg2[%c0, %c0_0, %c0_1] : memref<1x4x64xf32, #tpu.memory_space<vmem>>, vector<1x4x64xf32>
    %1 = vector.shape_cast %0 : vector<1x4x64xf32> to vector<4x64xf32>
    %c0_2 = arith.constant 0 : index
    %c0_3 = arith.constant 0 : index
    %2 = vector.load %arg3[%c0_2, %c0_3] : memref<8x4xf32, #tpu.memory_space<vmem>>, vector<8x4xf32>
    %c0_4 = arith.constant 0 : index
    %c0_5 = arith.constant 0 : index
    %3 = vector.load %arg4[%c0_4, %c0_5] : memref<8x1xf32, #tpu.memory_space<vmem>>, vector<8x1xf32>
    %4 = vector.shape_cast %3 : vector<8x1xf32> to vector<8x1xf32>
    %5 = vector.broadcast %4 : vector<8x1xf32> to vector<8x64xf32>
    %6 = vector.extract_strided_slice %2 {offsets = [0, 0], sizes = [8, 1], strides = [1, 1]} : vector<8x4xf32> to vector<8x1xf32>
    %7 = vector.extract_strided_slice %1 {offsets = [0, 0], sizes = [1, 64], strides = [1, 1]} : vector<4x64xf32> to vector<1x64xf32>
    %8 = vector.broadcast %6 : vector<8x1xf32> to vector<8x64xf32>
    %9 = vector.broadcast %7 : vector<1x64xf32> to vector<8x64xf32>
    %10 = arith.mulf %8, %9 : vector<8x64xf32>
    %11 = arith.addf %5, %10 : vector<8x64xf32>
    %12 = vector.extract_strided_slice %2 {offsets = [0, 1], sizes = [8, 1], strides = [1, 1]} : vector<8x4xf32> to vector<8x1xf32>
    %13 = vector.extract_strided_slice %1 {offsets = [1, 0], sizes = [1, 64], strides = [1, 1]} : vector<4x64xf32> to vector<1x64xf32>
    %14 = vector.broadcast %12 : vector<8x1xf32> to vector<8x64xf32>
    %15 = vector.broadcast %13 : vector<1x64xf32> to vector<8x64xf32>
    %16 = arith.mulf %14, %15 : vector<8x64xf32>
    %17 = arith.addf %11, %16 : vector<8x64xf32>
    %18 = vector.extract_strided_slice %2 {offsets = [0, 2], sizes = [8, 1], strides = [1, 1]} : vector<8x4xf32> to vector<8x1xf32>
    %19 = vector.extract_strided_slice %1 {offsets = [2, 0], sizes = [1, 64], strides = [1, 1]} : vector<4x64xf32> to vector<1x64xf32>
    %20 = vector.broadcast %18 : vector<8x1xf32> to vector<8x64xf32>
    %21 = vector.broadcast %19 : vector<1x64xf32> to vector<8x64xf32>
    %22 = arith.mulf %20, %21 : vector<8x64xf32>
    %23 = arith.addf %17, %22 : vector<8x64xf32>
    %24 = vector.extract_strided_slice %2 {offsets = [0, 3], sizes = [8, 1], strides = [1, 1]} : vector<8x4xf32> to vector<8x1xf32>
    %25 = vector.extract_strided_slice %1 {offsets = [3, 0], sizes = [1, 64], strides = [1, 1]} : vector<4x64xf32> to vector<1x64xf32>
    %26 = vector.broadcast %24 : vector<8x1xf32> to vector<8x64xf32>
    %27 = vector.broadcast %25 : vector<1x64xf32> to vector<8x64xf32>
    %28 = arith.mulf %26, %27 : vector<8x64xf32>
    %29 = arith.addf %23, %28 : vector<8x64xf32>
    %c0_6 = arith.constant 0 : index
    %c0_7 = arith.constant 0 : index
    %c0_8 = arith.constant 0 : index
    %30 = vector.load %arg5[%c0_6, %c0_7, %c0_8] : memref<1x8x64xf32, #tpu.memory_space<vmem>>, vector<1x8x64xf32>
    %31 = vector.shape_cast %30 : vector<1x8x64xf32> to vector<8x64xf32>
    %32 = vector.shape_cast %29 : vector<8x64xf32> to vector<1x8x64xf32>
    tpu.vector_store %arg5[%c0_6, %c0_7, %c0_8], %32 {strides = array<i32>} : memref<1x8x64xf32, #tpu.memory_space<vmem>>, vector<1x8x64xf32>,
    return
  }
  func.func @transform_0(%arg0: i32, %arg1: i32) -> (i32, i32, i32) {
    %c0_i32 = arith.constant 0 : i32
    %c0_i32_0 = arith.constant 0 : i32
    return %arg0, %c0_i32, %arg1 : i32, i32, i32
  }
  func.func @transform_1(%arg0: i32, %arg1: i32) -> (i32, i32) {
    %c0_i32 = arith.constant 0 : i32
    %c0_i32_0 = arith.constant 0 : i32
    %c0_i32_1 = arith.constant 0 : i32
    return %c0_i32, %c0_i32_0 : i32, i32
  }
  func.func @transform_2(%arg0: i32, %arg1: i32) -> (i32, i32) {
    %c0_i32 = arith.constant 0 : i32
    %c0_i32_0 = arith.constant 0 : i32
    %c0_i32_1 = arith.constant 0 : i32
    return %c0_i32, %c0_i32_0 : i32, i32
  }
  func.func @transform_3(%arg0: i32, %arg1: i32) -> (i32, i32, i32) {
    %c0_i32 = arith.constant 0 : i32
    %c0_i32_0 = arith.constant 0 : i32
    return %arg0, %c0_i32, %arg1 : i32, i32, i32
  }
}

</mosaic_0001>

<bundles_post_ra>
// kernel: tpu_custom_call.1
= control target key start
LH: loop header
LB: loop body
LE: loop exit
PB: predicated region body
PF: predicated region fallthrough
CT: control target
= control target key end

     0   :  { %8 = vsyncpa [#allocation3], 0  ;;  %s610_s0 = inlined_call_operand.vmem [shape: f32[2,4,64], index: 0, kind: input, shape index: {}]   ;;  %s611_s1 = inlined_call_operand.vmem [shape: f32[8,4], index: 1, kind: input, shape index: {}]   ;;  %s612_s2 = inlined_call_operand.vmem [shape: f32[8,1], index: 2, kind: input, shape index: {}]   ;;  %s613_s3 = inlined_call_operand.hbm [shape: f32[2,8,64], index: 3, kind: output, shape index: {}]  }
   0x1   :  { %10 = vsyncpa [#allocation3 + $0x1], 0  ;;  %s505_s12 = smov 0   ;;  %s507_s13 = smov 0  }
   0x2   :  { %s509_s14 = smov 0   ;;  %s511_s15 = smov 0  }
   0x3   :  { %s513_s16 = smov 0   ;;  %s515_s17 = smov 0  }
   0x4 LB: > { %s328_s18 = sadd.s32 4294967295, %s478_s17   ;;  %s329_s19 = sadd.s32 4294967294, %s478_s17   ;;  %s478_s17 = sphi %s515_s17, %s16_s17   ;;  %s474_s16 = sphi %s513_s16, %s620_s16   ;;  %s470_s15 = sphi %s511_s15, %s619_s15   ;;  %s466_s14 = sphi %s509_s14, %s618_s14   ;;  %s462_s13 = sphi %s507_s13, %s617_s13   ;;  %s458_s12 = sphi %s505_s12, %s616_s12  }
   0x5   : > { %s28_s20 = sadd.s32 1, %s474_s16  ;;  %s107_s21 = sadd.s32 1, %s466_s14 }
   0x6   : > { %p30_p0 = scmp.ge.s32.totalorder %s28_s20, 2  ;;  %p117_p1 = scmp.ne.s32.totalorder %s466_s14, %s462_s13 }
   0x7   : > { %p118_p2 = scmp.eq.s32.totalorder %s328_s18, 1  ;;  %p123_p3 = scmp.ne.s32.totalorder %s462_s13, %s458_s12 }
   0x8   : > { %s622_s20 = smov (%p30_p0, %s28_s20), 0  ;;  %p124_p5 = scmp.eq.s32.totalorder %s329_s19, 1 }
   0x9   : > { %p545_p4 = por %p118_p2, %p117_p1  ;;  %s102_s23 = ssub.s32 %s474_s16, %s622_s20 }
   0xa   : > { %p332_p6 = scmp.ge.s32.totalorder %s478_s17, 1  ;;  %p105_p7 = scmp.eq.s32.totalorder %s102_s23, 0 }
   0xb   : > { %p552_p8 = por %p124_p5, %p123_p3  ;;  %p158_p9 = scmp.lt.s32.totalorder %s478_s17, 3 }
   0xc   : > { %s558_s25 = scalar_select %p105_p7, %s466_s14, %s107_s21  }
   0xd   : > { %p159_p10 = pnand %p332_p6, %p158_p9 }
   0xe   : > { %p184_p11 = scmp.lt.s32.totalorder (!%p159_p10), %s470_s15, 1  ;;  %s181_s8 = sand.u32 (!%p159_p10), 1, %s462_s13  }
   0xf   : > { %162 = sbr.rel (%p159_p10) target bundleno = 172 (0xac), region = 32  ;;  %s333_s9 = sshll.u32 (!%p159_p10), %s181_s8, 3 }
  0x10   : > { %s336_s10 = sshll.u32 (!%p159_p10), %s470_s15, 7  ;;  %s183_s11 = scalar_lea.vmem (!%p159_p10), [#allocation2], %s333_s9 }
  0x11   : > { %s257_s18 = sshll.u32 (!%p159_p10), %s183_s11, 4  ;;  %s255_s23 = scalar_lea.hbm (!%p159_p10), %s613_s3, %s336_s10  ;;  %s258_s18 = int_to_ptr.vmem [resolvable:$true] %s257_s18 }
  0x12   : > { %s243_s26 = scalar_lea.sflag (!%p159_p10), [#allocation3], %s181_s8  ;;  %s402_s27 = scalar_lea.vmem (!%p159_p10), %s258_s18, 128 }
  0x13   : > { %p403_p12 = scmp.ne.s32.totalorder (!%p159_p10), %s258_s18, %s402_s27  ;;  %s484_s28 = smov (!%p159_p10), [#allocation2]  }
  0x14   : > { %v192_v0 = vld [vmem:[%s611_s1] sm:$0xff]  ;;  %v480_v1 = vmov 0   ;;  %v481_v2 = vmov 1   ;;  %v482_v4 = vmov 2   ;;  %v483_v5 = vmov 3   ;;  %s185_s30 = scalar_select %p184_p11, %s470_s15, 1 }
  0x15   : > { %398 = vset.pattern.permute.xlu0 %v480_v1  ;;  %399 = vset.pattern.permute.xlu1 %v481_v2  ;;  %v193_v3 = vld [vmem:[%s612_s2] sm:$0xff]  ;;  %v204_v6 = vlaneseq  ;;  %vm240_vm0 = vcmask 523264   ;;  %p404_p13 = pnand %p403_p12, %p545_p4  ;;  %s406_s29 = sshll.u32 %s484_s28, 4  ;;  %s407_s29 = int_to_ptr.vmem [resolvable:$false] %s406_s29 }
  0x16   : > { %201 = vperm.xlu0 %398, %v192_v0   ;;  %211 = vperm.xlu1 %399, %v192_v0   ;;  %s334_s4 = sshll.u32 %s185_s30, 2  ;;  %s408_s15 = scalar_lea.vmem %s407_s29, 256 }
  0x17   : > { %v205_v7 = vshrl.u32 %v204_v6, 7  ;;  %s190_s7 = scalar_lea.vmem %s610_s0, %s334_s4  ;;  %p405_p0 = pneg %p404_p13 }
  0x18   : > { %v191_v9 = vld [vmem:[%s190_s7] sm:$0xf]  ;;  %p409_p1 = scmp.lt.s32.totalorder %s258_s18, %s407_s29  ;;  %p410_p2 = scmp.lt.s32.totalorder %s408_s15, %s402_s27 }
  0x19   : > { %v206_v8 = vsub.s32 0, %v205_v7  ;;  %v216_v10 = vsub.s32 1, %v205_v7  ;;  %v226_v11 = vsub.s32 2, %v205_v7  ;;  %v236_v17 = vsub.s32 3, %v205_v7 }
  0x1a   : > { %196 = vperm.xlu0 %398, %v193_v3   ;;  %400 = vset.pattern.permute.xlu1 %v482_v4  ;;  %p411_p3 = por %p410_p2, %p409_p1 }
  0x1b   : > { %221 = vperm.xlu1 %400, %v192_v0   ;;  %v207_v12 = vrot.slane %v191_v9, %v206_v8  ;;  %v217_v15 = vrot.slane %v191_v9, %v216_v10  ;;  %v227_v16 = vrot.slane %v191_v9, %v226_v11  ;;  %v237_v24 = vrot.slane %v191_v9, %v236_v17 }
  0x1c   : > { %p412_p5 = pnand %p411_p3, %p405_p0 }
  0x1e   : > { %401 = vset.pattern.permute.xlu0 %v483_v5 }
  0x1f   : > { %231 = vperm.xlu0 %401, %v192_v0  }
  0x91   : > { %v202_v13 = vpop.permute.xlu0 %201  ;;  %v212_v14 = vpop.permute.xlu1 %211 }
  0x92   : > { %v208_v18 = vmul.f32 %v207_v12, %v202_v13  ;;  %v218_v20 = vmul.f32 %v217_v15, %v212_v14 }
  0x95   : > { %v197_v19 = vpop.permute.xlu0 %196 }
  0x96   : > { %v209_v21 = vadd.f32 %v208_v18, %v197_v19  ;;  %v222_v22 = vpop.permute.xlu1 %221 }
  0x97   : > { %v228_v23 = vmul.f32 %v227_v16, %v222_v22 }
  0x98   : > { %v219_v25 = vadd.f32 %v218_v20, %v209_v21 }
  0x9a   : > { %v229_v26 = vadd.f32 %v228_v23, %v219_v25  ;;  %v232_v27 = vpop.permute.xlu0 %231 }
  0x9b   : > { %v238_v28 = vmul.f32 %v237_v24, %v232_v27 }
  0x9d   : > { %v239_v29 = vadd.f32 %v238_v28, %v229_v26 }
  0x9f   : > { %241 = vst.msk [vmem:[%s183_s11] sm:$0xff] %vm240_vm0, %v239_v29 }
  0xa0   : > { %415 = shalt.err (!%p412_p5)
}
  0xa1   : > { %s416_s30 = scalar_lea.hbm %s255_s23, 128  ;;  %s420_s6 = scalar_lea.hbm %s613_s3, 256 }
  0xa2   : > { %p417_p6 = scmp.ne.s32.totalorder %s255_s23, %s416_s30  ;;  %p421_p10 = scmp.lt.s32.totalorder %s255_s23, %s613_s3 }
  0xa3   : > { %p422_p11 = scmp.lt.s32.totalorder %s420_s6, %s416_s30 }
  0xa4   : > { %p418_p7 = pnand %p417_p6, %p545_p4 }
  0xa5   : > { %p423_p12 = por %p422_p11, %p421_p10 }
  0xa6   : > { %p419_p9 = pneg %p418_p7 }
  0xa8   : > { %p424_p13 = pnand %p423_p12, %p419_p9 }
  0xaa   : > { %427 = shalt.err (!%p424_p13)
}
  0xab   : > { %339 = dma.vmem_to_hbm [thread:$0]  (%p545_p4), %s258_s18, 128, %s255_s23, %s243_s26  }
  0xac PF: > { %p345_p0 = scmp.ge.s32.totalorder %s478_s17, 2  ;;  %s269_s9 = sand.u32 1, %s458_s12  }
  0xad   : > { %s270_s10 = scalar_lea.sflag [#allocation3], %s269_s9 }
  0xae   : > { %p342_p1 = pnand %p345_p0, %p552_p8 }
  0xb0   : > { %p343_p2 = pneg %p342_p1 }
  0xb2   : > { %453 = dma.done.wait (%p343_p2), %s270_s10, 128  }
  0xb3   : > { %455 = vsyncadd (%p343_p2), %s270_s10, 4294967168  ;;  %s16_s17 = sadd.s32 1, %s478_s17   ;;  %s616_s12 = smov %s462_s13 }
  0xb4   : > { %p13_p3 = scmp.ge.s32.totalorder %s16_s17, 4   ;;  %s617_s13 = smov %s466_s14 }
  0xb5   : > { %s618_s14 = smov %s558_s25  ;;  %s619_s15 = smov %s474_s16 }
  0xb6   : > { %s620_s16 = smov %s622_s20  ;;  %15 = sbr.rel (!%p13_p3) target bundleno = 4 (0x4), region = 67 }
  0xbb   :  { %275 = vsyncpa [#allocation3], 1 }
  0xbc   :  { %277 = vsyncpa [#allocation3 + $0x1], 1 }

</bundles_post_ra>
